<compile_context>
chip_gen: v5e
topology: v5e:2x2
jax: 0.10.0
libtpu: 0.0.40
codegen_flags: <defaults>
</compile_context>

<pallas_src>
import jax
import jax.numpy as jnp
from jax.experimental import pallas as pl
from jax.experimental.pallas import tpu as pltpu


# ----------------------------------------------------------------------------
# small helpers
# ----------------------------------------------------------------------------
def _round_up(x, m):
    return -(-x // m) * m


def _to_tuple(v, dimension):
    if isinstance(v, int):
        return (int(v),) * dimension
    v = tuple(int(x) for x in v)
    assert len(v) == dimension
    return v


# ----------------------------------------------------------------------------
# Pallas kernel:
#   out[i*tn:(i+1)*tn, :] = sum_k gathered[k, i*tn:(i+1)*tn, :] @ W[k]
# grid = (N_p // tn, K); the kernel-offset axis K is the innermost reduction.
# ----------------------------------------------------------------------------
def _sparse_conv_kernel(nz_ref, g_ref, w_ref, o_ref, acc_ref):
    i = pl.program_id(0)
    k = pl.program_id(1)
    nk = pl.num_programs(1)

    @pl.when(k == 0)
    def _init():
        acc_ref[...] = jnp.zeros_like(acc_ref)

    # Skip tiles whose kernel map has no valid neighbour at this offset:
    # their gathered rows are all zero, so the MXU work can be dropped.
    @pl.when(nz_ref[i * nk + k] > 0)
    def _accumulate():
        acc_ref[...] += jnp.dot(
            g_ref[...], w_ref[k], preferred_element_type=jnp.float32
        )

    @pl.when(k == nk - 1)
    def _finalize():
        o_ref[...] = acc_ref[...].astype(o_ref.dtype)


def _choose_row_tile(n_rows, cin_p, cout_p, kvol, in_itemsize, out_itemsize,
                     target_rows, vmem_budget_bytes):
    """Largest multiple-of-128 row tile <= target that fits the VMEM budget."""

    def vmem_estimate(tn):
        return (2 * tn * cin_p * in_itemsize              # gathered double buffer
                + 2 * kvol * cin_p * cout_p * in_itemsize  # resident weights (x2 safety)
                + tn * cout_p * 4                          # f32 accumulator scratch
                + 2 * tn * cout_p * out_itemsize)          # output double buffer

    tn = max(128, 128 * (min(int(target_rows), _round_up(n_rows, 128)) // 128))
    while tn > 128 and vmem_estimate(tn) > vmem_budget_bytes:
        tn -= 128
    # Keep >= 2 row blocks when possible so the "parallel" row axis can be
    # split across v7x's two TensorCores.
    while tn > 128 and -(-n_rows // tn) < 2:
        tn -= 128
    return tn, vmem_estimate(tn)


def sparse_conv_matmul(gathered, weights, nz, *, tn, out_dtype,
                       vmem_limit_bytes):
    """gathered: (K, N_p, Cin_p), weights: (K, Cin_p, Cout_p),
    nz: (N_p//tn * K,) int32 tile non-zero table  ->  (N_p, Cout_p)."""
    K, N_p, Cin_p = gathered.shape
    Kw, Cin_w, Cout_p = weights.shape
    assert K == Kw and Cin_p == Cin_w
    assert N_p % tn == 0 and Cin_p % 128 == 0 and Cout_p % 128 == 0

    n_tiles = N_p // tn
    cost = pl.CostEstimate(
        flops=2 * K * N_p * Cin_p * Cout_p,
        transcendentals=0,
        bytes_accessed=(gathered.size * gathered.dtype.itemsize
                        + weights.size * weights.dtype.itemsize
                        + N_p * Cout_p * jnp.dtype(out_dtype).itemsize
                        + nz.size * 4),
    )
    return pl.pallas_call(
        _sparse_conv_kernel,
        out_shape=jax.ShapeDtypeStruct((N_p, Cout_p), out_dtype),
        grid_spec=pltpu.PrefetchScalarGridSpec(
            num_scalar_prefetch=1,           # nz table lands in SMEM
            grid=(n_tiles, K),
            in_specs=[
                # gathered features: one (tn, Cin_p) slab per (row tile, offset)
                pl.BlockSpec((pl.Squeezed(), tn, Cin_p),
                             lambda i, k, _nz: (k, i, 0)),
                # full weight tensor, VMEM-resident across the whole grid
                pl.BlockSpec((K, Cin_p, Cout_p), lambda i, k, _nz: (0, 0, 0)),
            ],
            out_specs=pl.BlockSpec((tn, Cout_p), lambda i, k, _nz: (i, 0)),
            scratch_shapes=[pltpu.VMEM((tn, Cout_p), jnp.float32)],
        ),
        compiler_params=pltpu.CompilerParams(
            dimension_semantics=("parallel", "arbitrary"),
            vmem_limit_bytes=vmem_limit_bytes,
        ),
        cost_estimate=cost,
    )(nz, gathered, weights)


# ----------------------------------------------------------------------------
# JAX glue: kernel-offset generation, kernel map (coordinate matching), gather.
# These correspond to KernelGenerator / CoordinateManager in MinkowskiEngine.
# ----------------------------------------------------------------------------
def hypercube_offsets(kernel_size, dilation, dimension):
    """Region offsets of an odd hyper-cube kernel -> (K, D) int32."""
    axes = []
    for d in range(dimension):
        half = (kernel_size[d] - 1) // 2
        axes.append(jnp.arange(-half, half + 1, dtype=jnp.int32) * dilation[d])
    grids = jnp.meshgrid(*axes, indexing="ij")
    # TODO(synk): the enumeration order must match MinkowskiEngine's kernel
    # region iterator so kernel[k] pairs with the same spatial offset.
    return jnp.stack([g.reshape(-1) for g in grids], axis=-1)


def build_kernel_map(coords, offsets):
    """idx[k, m] = input row whose coordinate equals out_coord[m] + offset[k]
    (same batch), or -1 if absent.

    Sorted-key lookup: encode every (batch, x, ...) coordinate into one int32
    key, sort once, searchsorted per offset — O((K+1)*N*log N) instead of the
    all-pairs O(K*N^2) comparison.  Assumes the product of coordinate extents
    fits in int32 (true for typical voxel grids)."""
    N = coords.shape[0]
    K = offsets.shape[0]
    mins = coords.min(axis=0)
    shifted = coords - mins
    extents = shifted.max(axis=0) + 1
    strides = jnp.concatenate(
        [jnp.cumprod(extents[::-1])[::-1][1:], jnp.ones((1,), extents.dtype)])
    keys = (shifted * strides).sum(-1)
    order = jnp.argsort(keys)
    skeys = keys[order]

    full_offsets = jnp.concatenate(
        [jnp.zeros((K, 1), offsets.dtype), offsets], axis=1)   # batch offset 0
    tgt = coords[None, :, :] + full_offsets[:, None, :]        # (K, N, 1+D)
    tsh = tgt - mins
    in_range = jnp.all((tsh >= 0) & (tsh < extents), axis=-1)  # (K, N)
    tkeys = (tsh * strides).sum(-1)
    pos = jnp.clip(jnp.searchsorted(skeys, tkeys), 0, N - 1)
    found = in_range & (skeys[pos] == tkeys)
    return jnp.where(found, order[pos], -1).astype(jnp.int32)


def _build_kernel_map_bruteforce(coords, offsets):
    """Reference O(K*N^2) all-pairs kernel map (validation only)."""
    N = coords.shape[0]
    K = offsets.shape[0]
    tgt_sp = coords[None, :, 1:] + offsets[:, None, :]
    tgt = jnp.concatenate(
        [jnp.broadcast_to(coords[None, :, :1], (K, N, 1)), tgt_sp], axis=-1)
    eq = jnp.all(tgt[:, :, None, :] == coords[None, None, :, :], axis=-1)
    found = jnp.any(eq, axis=-1)
    idx = jnp.argmax(eq, axis=-1).astype(jnp.int32)
    return jnp.where(found, idx, -1)


# ----------------------------------------------------------------------------
# Module analogue
# ----------------------------------------------------------------------------
class CustomMinkowskiConvolutionPallas:
    """Pallas analogue of CustomMinkowskiConvolution.forward (stride == 1).

    row_tile:          target rows per grid step (multiple of 128).  256 is a
                       safe default on all generations; on v5e/v6e (128 MiB
                       VMEM) 1024-2048 amortises per-step overhead further; on
                       v7x keep vmem_budget_bytes sized for its 64 MiB VMEM.
    compute_dtype:     MXU operand dtype (bf16 default, f32 accumulation).
    vmem_budget_bytes: budget used when auto-capping row_tile.
    """

    def __init__(self, kernel_size, stride, dilation, dimension, *,
                 compute_dtype=jnp.bfloat16, row_tile=256,
                 vmem_budget_bytes=40 * 1024 * 1024):
        self.dimension = dimension
        self.kernel_size = _to_tuple(kernel_size, dimension)
        self.stride = _to_tuple(stride, dimension)
        self.dilation = _to_tuple(dilation, dimension)
        kv = 1
        for k in self.kernel_size:
            kv *= k
        self.kernel_volume = kv
        self.use_mm = (all(k == 1 for k in self.kernel_size)
                       and all(s == 1 for s in self.stride))
        self.compute_dtype = jnp.dtype(compute_dtype)
        self.row_tile = int(row_tile)
        self.vmem_budget_bytes = int(vmem_budget_bytes)
        # TODO(synk): stride > 1 requires the coordinate-manager's strided
        # output-coordinate map; only stride == 1 is implemented here.
        assert all(s == 1 for s in self.stride), "only stride=1 supported"

    def __call__(self, kernel, coords, feats):
        """kernel: (kernel_volume, Cin, Cout); coords: (N, 1+D) int32;
        feats: (N, Cin).  Returns (out_feats (N, Cout), out_coords)."""
        assert coords.shape[1] - 1 == self.dimension
        assert kernel.shape[0] == self.kernel_volume
        N, Cin = feats.shape
        Cout = kernel.shape[-1]
        cdt = self.compute_dtype

        if self.use_mm:
            # forward's `input.F.mm(kernel.reshape(Cin, Cout))` branch ==
            # K=1 identity kernel map.
            idx = jnp.arange(N, dtype=jnp.int32)[None, :]
            weights = kernel.reshape(1, Cin, Cout)
        else:
            offs = hypercube_offsets(self.kernel_size, self.dilation,
                                     self.dimension)
            idx = build_kernel_map(coords, offs)            # (K, N)
            weights = kernel
        K = weights.shape[0]

        # --- lane-dense padding: channels up to multiples of 128 ----------
        cin_p = _round_up(Cin, 128)
        cout_p = _round_up(Cout, 128)

        tn, vmem_est = _choose_row_tile(
            N, cin_p, cout_p, K, cdt.itemsize,
            jnp.dtype(feats.dtype).itemsize, self.row_tile,
            self.vmem_budget_bytes)
        n_p = _round_up(max(N, tn), tn)
        vmem_limit = int(min(max(vmem_est + (8 << 20), 32 << 20), 56 << 20))

        feats_c = jnp.pad(feats.astype(cdt),
                          ((0, n_p - N), (0, cin_p - Cin)))
        weights_c = jnp.pad(weights.astype(cdt),
                            ((0, 0), (0, cin_p - Cin), (0, cout_p - Cout)))
        idx_p = jnp.pad(idx, ((0, 0), (0, n_p - N)), constant_values=-1)

        # Gather in compute_dtype (bf16) so the K-times-duplicated HBM array
        # carries half the bytes.  Missing neighbours (idx<0) gather as zeros.
        # TODO(synk): fuse this gather into the Pallas kernel (feats kept in
        # memory_space=pl.ANY + manual per-row DMAs driven by the prefetched
        # kernel map) to remove the K-times HBM duplication entirely.
        valid = idx_p >= 0
        gathered = jnp.take(feats_c, jnp.maximum(idx_p, 0), axis=0)
        gathered = jnp.where(valid[..., None], gathered, jnp.zeros((), cdt))

        # per-(row tile, offset) "any valid neighbour" table, scalar-prefetched
        # into SMEM so the kernel can skip all-zero tiles on the MXU.
        nz = jnp.any(valid.reshape(K, n_p // tn, tn), axis=-1)   # (K, n_tiles)
        nz = nz.T.reshape(-1).astype(jnp.int32)                  # (n_tiles*K,)

        out_p = sparse_conv_matmul(gathered, weights_c, nz, tn=tn,
                                   out_dtype=feats.dtype,
                                   vmem_limit_bytes=vmem_limit)
        return out_p[:N, :Cout], coords


# ----------------------------------------------------------------------------
# Demo / self-check
# ----------------------------------------------------------------------------
if __name__ == "__main__":
    key = jax.random.PRNGKey(0)
    k_sel0, k_sel1, k_feat, k_w3, k_w1 = jax.random.split(key, 5)

    dimension = 2
    Cin, Cout = 64, 96                 # deliberately not multiples of 128
    grid_side = 32                     # coordinates on a 32x32 grid
    pts_per_batch = 256                # 2 batches -> N = 512 points

    all_cells = jnp.stack(
        jnp.meshgrid(jnp.arange(grid_side), jnp.arange(grid_side),
                     indexing="ij"),
        axis=-1,
    ).reshape(-1, 2).astype(jnp.int32)                           # (1024, 2)
    sel0 = jax.random.permutation(k_sel0, grid_side * grid_side)[:pts_per_batch]
    sel1 = jax.random.permutation(k_sel1, grid_side * grid_side)[:pts_per_batch]
    coords = jnp.concatenate(
        [
            jnp.concatenate(
                [jnp.zeros((pts_per_batch, 1), jnp.int32), all_cells[sel0]], 1),
            jnp.concatenate(
                [jnp.ones((pts_per_batch, 1), jnp.int32), all_cells[sel1]], 1),
        ],
        axis=0,
    )                                                            # (512, 3)
    N = coords.shape[0]
    feats = jax.random.normal(k_feat, (N, Cin), dtype=jnp.float32)

    # ---- general path: kernel_size=3, stride=1, dilation=1, dimension=2 ----
    conv3 = CustomMinkowskiConvolutionPallas(
        kernel_size=3, stride=1, dilation=1, dimension=dimension)
    w3 = jax.random.normal(k_w3, (conv3.kernel_volume, Cin, Cout),
                           dtype=jnp.float32)
    out3, _ = conv3(w3, coords, feats)
    out3 = jax.block_until_ready(out3)
    assert out3.shape == (N, Cout)
    assert out3.dtype == feats.dtype

    # kernel map: fast sorted-key builder must match the brute-force reference
    offs = hypercube_offsets(conv3.kernel_size, conv3.dilation, dimension)
    idx_fast = build_kernel_map(coords, offs)
    idx_ref = _build_kernel_map_bruteforce(coords, offs)
    assert jnp.array_equal(idx_fast, idx_ref)

    # pure-JAX reference (same bf16-rounded operands, f32 accumulation)
    f_bf = feats.astype(jnp.bfloat16).astype(jnp.float32)
    w_bf = w3.astype(jnp.bfloat16).astype(jnp.float32)
    g_ref = jnp.where((idx_ref >= 0)[..., None],
                      f_bf[jnp.maximum(idx_ref, 0)], 0.0)
    ref3 = jnp.einsum("knc,kcd->nd", g_ref, w_bf)
    assert jnp.allclose(out3, ref3, rtol=1e-2, atol=1e-2)

    # ---- use_mm path: kernel_size=1, stride=1 (pointwise matmul) ----
    conv1 = CustomMinkowskiConvolutionPallas(
        kernel_size=1, stride=1, dilation=1, dimension=dimension)
    w1 = jax.random.normal(k_w1, (1, Cin, Cout), dtype=jnp.float32)
    out1, _ = conv1(w1, coords, feats)
    out1 = jax.block_until_ready(out1)
    ref1 = f_bf @ w1.reshape(Cin, Cout).astype(jnp.bfloat16).astype(jnp.float32)
    assert jnp.allclose(out1, ref1, rtol=1e-2, atol=1e-2)

    print("KERNEL_OK")
</pallas_src>

<mosaic_0001>
module attributes {stable_mosaic.version = 11 : i64} {
  func.func @_sparse_conv_kernel(%arg0: i32, %arg1: i32, %arg2: memref<18xi32, #tpu.memory_space<smem>>, %arg3: memref<1x256x128xbf16, #tpu.memory_space<vmem>>, %arg4: memref<9x128x128xbf16, #tpu.memory_space<vmem>>, %arg5: memref<256x128xf32, #tpu.memory_space<vmem>>, %arg6: memref<256x128xf32, #tpu.memory_space<vmem>>) attributes {dimension_semantics = [#tpu.dimension_semantics<parallel>, #tpu.dimension_semantics<arbitrary>], iteration_bounds = array<i64: 2, 9>, scalar_prefetch = 1 : i64, scratch_operands = 1 : i64, tpu.core_type = #tpu.core_type<tc>, window_params = [{transform_indices = @transform_0, window_bounds = array<i64: 1, 256, 128>}, {pipeline_mode = #tpu.pipeline_mode<synchronous>, transform_indices = @transform_1, window_bounds = array<i64: 9, 128, 128>}, {transform_indices = @transform_2, window_bounds = array<i64: 256, 128>}]} {
    %c0_i32 = arith.constant 0 : i32
    %0 = arith.cmpi eq, %arg1, %c0_i32 : i32
    %1 = arith.extui %0 : i1 to i32
    %c0_i32_0 = arith.constant 0 : i32
    %2 = arith.cmpi ne, %1, %c0_i32_0 : i32
    scf.if %2 {
      %cst = arith.constant 0.000000e+00 : f32
      %13 = vector.broadcast %cst : f32 to vector<256x128xf32>
      %c0 = arith.constant 0 : index
      %c0_4 = arith.constant 0 : index
      %14 = vector.load %arg6[%c0, %c0_4] : memref<256x128xf32, #tpu.memory_space<vmem>>, vector<256x128xf32>
      tpu.vector_store %arg6[%c0, %c0_4], %13 {strides = array<i32>} : memref<256x128xf32, #tpu.memory_space<vmem>>, vector<256x128xf32>,
    } else {
    }
    %c9_i32 = arith.constant 9 : i32
    %3 = arith.muli %arg0, %c9_i32 : i32
    %4 = arith.addi %3, %arg1 : i32
    %5 = arith.index_cast %4 : i32 to index
    %6 = memref.load %arg2[%5] : memref<18xi32, #tpu.memory_space<smem>>
    %c0_i32_1 = arith.constant 0 : i32
    %7 = arith.cmpi sgt, %6, %c0_i32_1 : i32
    %8 = arith.extui %7 : i1 to i32
    %c0_i32_2 = arith.constant 0 : i32
    %9 = arith.cmpi ne, %8, %c0_i32_2 : i32
    scf.if %9 {
      %c0 = arith.constant 0 : index
      %c0_4 = arith.constant 0 : index
      %13 = vector.load %arg6[%c0, %c0_4] : memref<256x128xf32, #tpu.memory_space<vmem>>, vector<256x128xf32>
      %c0_5 = arith.constant 0 : index
      %c0_6 = arith.constant 0 : index
      %c0_7 = arith.constant 0 : index
      %14 = vector.load %arg3[%c0_5, %c0_6, %c0_7] : memref<1x256x128xbf16, #tpu.memory_space<vmem>>, vector<1x256x128xbf16>
      %15 = vector.shape_cast %14 : vector<1x256x128xbf16> to vector<256x128xbf16>
      %16 = arith.index_cast %arg1 : i32 to index
      %c0_8 = arith.constant 0 : index
      %c0_9 = arith.constant 0 : index
      %17 = vector.load %arg4[%16, %c0_8, %c0_9] : memref<9x128x128xbf16, #tpu.memory_space<vmem>>, vector<1x128x128xbf16>
      %18 = vector.shape_cast %17 : vector<1x128x128xbf16> to vector<128x128xbf16>
      %cst = arith.constant dense<0.000000e+00> : vector<256x128xf32>
      %19 = tpu.matmul %15, %18, %cst {dimension_numbers = #tpu.dot_dimension_numbers<[1], [0], [0], [1], [0, 0, 1, 1], [], []>} : vector<256x128xbf16>, vector<128x128xbf16>, vector<256x128xf32> -> vector<256x128xf32>
      %20 = arith.addf %13, %19 : vector<256x128xf32>
      %c0_10 = arith.constant 0 : index
      %c0_11 = arith.constant 0 : index
      %21 = vector.load %arg6[%c0_10, %c0_11] : memref<256x128xf32, #tpu.memory_space<vmem>>, vector<256x128xf32>
      tpu.vector_store %arg6[%c0_10, %c0_11], %20 {strides = array<i32>} : memref<256x128xf32, #tpu.memory_space<vmem>>, vector<256x128xf32>,
    } else {
    }
    %c8_i32 = arith.constant 8 : i32
    %10 = arith.cmpi eq, %arg1, %c8_i32 : i32
    %11 = arith.extui %10 : i1 to i32
    %c0_i32_3 = arith.constant 0 : i32
    %12 = arith.cmpi ne, %11, %c0_i32_3 : i32
    scf.if %12 {
      %c0 = arith.constant 0 : index
      %c0_4 = arith.constant 0 : index
      %13 = vector.load %arg6[%c0, %c0_4] : memref<256x128xf32, #tpu.memory_space<vmem>>, vector<256x128xf32>
      %c0_5 = arith.constant 0 : index
      %c0_6 = arith.constant 0 : index
      %14 = vector.load %arg5[%c0_5, %c0_6] : memref<256x128xf32, #tpu.memory_space<vmem>>, vector<256x128xf32>
      tpu.vector_store %arg5[%c0_5, %c0_6], %13 {strides = array<i32>} : memref<256x128xf32, #tpu.memory_space<vmem>>, vector<256x128xf32>,
    } else {
    }
    return
  }
  func.func @transform_0(%arg0: i32, %arg1: i32, %arg2: memref<18xi32, #tpu.memory_space<smem>>) -> (i32, i32, i32) {
    %c0_i32 = arith.constant 0 : i32
    %c0_i32_0 = arith.constant 0 : i32
    return %arg1, %arg0, %c0_i32 : i32, i32, i32
  }
  func.func @transform_1(%arg0: i32, %arg1: i32, %arg2: memref<18xi32, #tpu.memory_space<smem>>) -> (i32, i32, i32) {
    %c0_i32 = arith.constant 0 : i32
    %c0_i32_0 = arith.constant 0 : i32
    %c0_i32_1 = arith.constant 0 : i32
    %c0_i32_2 = arith.constant 0 : i32
    return %c0_i32, %c0_i32_0, %c0_i32_1 : i32, i32, i32
  }
  func.func @transform_2(%arg0: i32, %arg1: i32, %arg2: memref<18xi32, #tpu.memory_space<smem>>) -> (i32, i32) {
    %c0_i32 = arith.constant 0 : i32
    %c0_i32_0 = arith.constant 0 : i32
    return %arg0, %c0_i32 : i32, i32
  }
}

</mosaic_0001>

<bundles_post_ra>
// kernel: tpu_custom_call.1
= control target key start
LH: loop header
LB: loop body
LE: loop exit
PB: predicated region body
PF: predicated region fallthrough
CT: control target
= control target key end

     0   :  { %s1304_s15 = smov [#allocation4]   ;;  %s1603_s0 = inlined_call_operand.hbm [shape: s32[18], index: 0, kind: input, shape index: {}]   ;;  %s1604_s1 = inlined_call_operand.hbm [shape: bf16[9,512,128], index: 1, kind: input, shape index: {}]   ;;  %s1605_s2 = inlined_call_operand.hbm [shape: bf16[9,128,128], index: 2, kind: input, shape index: {}]   ;;  %s1606_s3 = inlined_call_operand.hbm [shape: f32[512,128], index: 3, kind: output, shape index: {}]  }
   0x1   :  { %1616 = sst [smem:[#allocation21_spill]] %s1605_s2  ;;  %s9_s14 = sshll.u32 %s1603_s0, 4  ;;  %s10_s14 = int_to_ptr.hbm [resolvable:$true] %s9_s14 }
   0x2   :  { %1617 = sst [smem:[#allocation22_spill]] %s1606_s3 }
   0x3   :  { %12 = dma.hbm_to_smem %s10_s14, 16, %s1304_s15, [#allocation3] }
   0x4   :  { %1246 = dma.done.wait [#allocation3], 16 }
   0x5   :  { %1247 = vsyncadd [#allocation3], 4294967280 }
   0x6   :  { %15 = sfence }
   0x7   :  { %16 = vsyncpa [#allocation6], 0 }
   0x8   :  { %18 = vsyncpa [#allocation6 + $0x1], 0 }
   0x9   :  { %19 = vsyncpa [#allocation9], 0 }
   0xa   :  { %20 = vsyncpa [#allocation7], 0 }
   0xb   :  { %22 = vsyncpa [#allocation7 + $0x1], 0  ;;  %s1334_s16 = smov 0   ;;  %s1336_s17 = smov 0  }
   0xc   :  { %s1338_s18 = smov 0   ;;  %s1340_s19 = smov 0  }
   0xd   :  { %s1342_s0 = smov 0   ;;  %s1344_s20 = smov 0  }
   0xe   :  { %s1346_s21 = smov 0   ;;  %s1348_s22 = smov 0  }
   0xf   :  { %s1350_s23 = smov 0   ;;  %s1352_s24 = smov 0  }
  0x10   :  { %s1354_s25 = smov 0  }
  0x11 LB: > { %1618 = sst [smem:[#allocation15_spill]] %s1262_s16  ;;  %s814_s26 = sadd.s32 4294967295, %s1302_s25   ;;  %s1302_s25 = sphi %s1354_s25, %s28_s25   ;;  %s1298_s24 = sphi %s1352_s24, %s1650_s24   ;;  %s1294_s23 = sphi %s1350_s23, %s1649_s23   ;;  %s1290_s22 = sphi %s1348_s22, %s1648_s22   ;;  %s1286_s21 = sphi %s1346_s21, %s1647_s21   ;;  %s1282_s20 = sphi %s1344_s20, %s1646_s20   ;;  %s1278_s0 = sphi %s1342_s0, %s1645_s0   ;;  %s1274_s19 = sphi %s1340_s19, %s1644_s19   ;;  %s1270_s18 = sphi %s1338_s18, %s1643_s18   ;;  %s1266_s17 = sphi %s1336_s17, %s1642_s17   ;;  %s1262_s16 = sphi %s1334_s16, %s1641_s16  }
  0x12   : > { %1619 = sst [smem:[#allocation16_spill]] %s1290_s22  ;;  %s815_s27 = sadd.s32 4294967294, %s1302_s25  }
  0x13   : > { %p62_p0 = scmp.ne.s32.totalorder %s1278_s0, %s1274_s19  ;;  %p1390_p1 = scmp.eq.s32.totalorder %s814_s26, 0 }
  0x14   : > { %p106_p2 = scmp.ne.s32.totalorder %s1270_s18, %s1266_s17  ;;  %p107_p3 = scmp.eq.s32.totalorder %s814_s26, 17 }
  0x15   : > { %p1398_p4 = por %p1390_p1, %p62_p0  ;;  %p112_p5 = scmp.ne.s32.totalorder %s1266_s17, %s1262_s16 }
  0x16   : > { %p1404_p6 = por %p107_p3, %p106_p2  ;;  %p113_p7 = scmp.eq.s32.totalorder %s815_s27, 17 }
  0x17   : > { %p816_p8 = scmp.ge.s32.totalorder %s1302_s25, 1  ;;  %p120_p9 = scmp.lt.s32.totalorder %s1302_s25, 19 }
  0x18   : > { %s1622_s30 = scalar_select %p1404_p6, 1, 0 }
  0x19   : > { %p1410_p10 = por %p113_p7, %p112_p5  ;;  %p1414_p11 = pnand %p816_p8, %p120_p9 }
  0x1a   : > { %1623 = sst [smem:[#allocation17_spill]] %s1622_s30  ;;  %s1305_s9 = smov [#allocation8]  }
  0x1b   : > { %s1624_s4 = scalar_select %p1410_p10, 1, 0 }
  0x1c   : > { %s1627_s2 = sld [smem:[#allocation21_spill]]  ;;  %p991_p12 = pneg %p1414_p11 }
  0x1d   : > { %1625 = sst [smem:[#allocation18_spill]] %s1624_s4  ;;  %s133_s10 = sshll.u32 %s1305_s9, 4  ;;  %s134_s10 = int_to_ptr.vmem [resolvable:$true] %s133_s10 }
  0x1e   : > { %p992_p13 = pnand %p991_p12, %p1390_p1  ;;  %s1607_s11 = smov 64  }
  0x1f   : > { %s1608_s12 = smov 4   ;;  %s37_s13 = sadd.s32 1, %s1294_s23 }
  0x20   : > { %p38_p0 = scmp.ge.s32.totalorder %s37_s13, 9  ;;  %s40_s14 = sadd.s32 1, %s1298_s24 }
  0x21   : > { %p56_p2 = scmp.ne.s32.totalorder %s1282_s20, %s1278_s0  ;;  %p57_p3 = scmp.eq.s32.totalorder %s1302_s25, 0 }
  0x22   : > { %s131_s8 = sshll.u32 %s1627_s2, 4  ;;  %s1652_s13 = smov (%p38_p0, %s37_s13), 0  ;;  %s132_s8 = int_to_ptr.hbm [resolvable:$true] %s131_s8 }
  0x23   : > { %994 = dma.hbm_to_vmem [thread:$0]  (!%p992_p13), %s132_s8, 9216, %s134_s10, [#allocation9], %s1607_s11, %s1607_s11, %s1608_s12  }
  0x24   : > { %1628 = sst [smem:[#allocation19_spill]] %s1652_s13  ;;  %s1654_s14 = smov (!%p38_p0, %s40_s14), %s1298_s24 }
  0x25   : > { %s44_s15 = ssub.s32 %s1294_s23, %s1652_s13  ;;  %s49_s19 = sadd.s32 1, %s1282_s20 }
  0x26   : > { %p42_p5 = scmp.ge.s32.totalorder %s1654_s14, 2  ;;  %p1439_p7 = por %p57_p3, %p56_p2 }
  0x27   : > { %s96_s27 = sadd.s32 1, %s1270_s18  ;;  %s147_s6 = sand.u32 1, %s1282_s20  }
  0x28   : > { %s1656_s14 = smov (%p42_p5, %s1654_s14), 0  ;;  %p1004_p8 = scmp.lt.s32.totalorder %s1302_s25, 18 }
  0x29   : > { %1630 = sst [smem:[#allocation20_spill]] %s1656_s14  ;;  %s819_s7 = sshll.u32 %s147_s6, 7 }
  0x2a   : > { %s45_s8 = ssub.s32 %s1298_s24, %s1656_s14  ;;  %s820_s10 = sshll.u32 %s1298_s24, 5 }
  0x2b   : > { %s46_s9 = sor.u32 %s45_s8, %s44_s15  ;;  %p94_p9 = scmp.eq.s32.totalorder %s45_s8, 0 }
  0x2c   : > { %p47_p12 = scmp.eq.s32.totalorder %s46_s9, 0  ;;  %s821_s2 = sshll.u32 %s1294_s23, 6 }
  0x2d   : > { %s1452_s11 = scalar_select %p94_p9, %s1270_s18, %s96_s27  }
  0x2e   : > { %s1455_s12 = scalar_select %p47_p12, %s1282_s20, %s49_s19  }
  0x2f   : > { %s151_s13 = scalar_lea.vmem [#allocation5], %s819_s7  ;;  %s156_s16 = sadd.s32 %s821_s2, %s820_s10 }
  0x30   : > { %s161_s4 = sshll.u32 %s151_s13, 4  ;;  %s822_s3 = sshll.u32 %s156_s16, 2  ;;  %s162_s4 = int_to_ptr.vmem [resolvable:$true] %s161_s4 }
  0x31   : > { %p996_p13 = pnand %p1004_p8, %p1439_p7  ;;  %s158_s14 = scalar_lea.hbm %s1604_s1, %s822_s3 }
  0x32   : > { %s159_s15 = sshll.u32 %s158_s14, 4  ;;  %s148_s8 = scalar_lea.sflag [#allocation6], %s147_s6  ;;  %s160_s15 = int_to_ptr.hbm [resolvable:$true] %s159_s15 }
  0x33   : > { %s1631_s27 = smov 4   ;;  %s1632_s9 = smov 64  }
  0x34   : > { %998 = dma.hbm_to_vmem [thread:$0]  (!%p996_p13), %s160_s15, 2048, %s162_s4, %s148_s8, %s1632_s9, %s1632_s9, %s1631_s27  }
  0x35   : > { %173 = sbr.rel (%p1414_p11) target bundleno = 410 (0x19a), region = 28  ;;  %s175_s2 = sand.u32 (!%p1414_p11), 1, %s1278_s0  }
  0x36   : > { %s824_s16 = sshll.u32 (!%p1414_p11), %s175_s2, 7  ;;  %s176_s13 = scalar_lea.sflag (!%p1414_p11), [#allocation6], %s175_s2 }
  0x37   : > { %s1471_s19 = scalar_lea.vmem (!%p1414_p11), [#allocation5], %s824_s16 }
  0x3a   : > { %1249 = dma.done.wait (%p1398_p4), %s176_s13, 2048  }
  0x3b   : > { %1251 = vsyncadd (%p1398_p4), %s176_s13, 4294965248 }
  0x3c   : > { %1253 = dma.done.wait (%p1390_p1), [#allocation9], 9216  }
  0x3d   : > { %1255 = vsyncadd (%p1390_p1), [#allocation9], 4294958080  ;;  %s203_s3 = sand.u32 1, %s1266_s17   ;;  %p827_p11 = scmp.ne.s32.totalorder %s1286_s21, 0 }
  0x3e   : > { %s826_s22 = sshll.u32 %s203_s3, 8 }
  0x3f   : > { %s1484_s30 = scalar_lea.vmem [#allocation10], %s826_s22  ;;  %211 = sbr.rel (%p827_p11) target bundleno = 101 (0x65), region = 40 }
  0x44   : > { %v1308_v0 = vmov 0.0  }
  0x45   : > { %212 = vst [vmem:[#allocation2 + $0xb0] sm:$0xff] %v1308_v0 }
  0x46   : > { %213 = vst [vmem:[#allocation2] sm:$0xff] %v1308_v0 }
  0x47   : > { %214 = vst [vmem:[#allocation2 + $0xd8] sm:$0xff] %v1308_v0 }
  0x48   : > { %215 = vst [vmem:[#allocation2 + $0x18] sm:$0xff] %v1308_v0 }
  0x49   : > { %216 = vst [vmem:[#allocation2 + $0x50] sm:$0xff] %v1308_v0 }
  0x4a   : > { %217 = vst [vmem:[#allocation2 + $0x68] sm:$0xff] %v1308_v0 }
  0x4b   : > { %218 = vst [vmem:[#allocation2 + $0x30] sm:$0xff] %v1308_v0 }
  0x4c   : > { %219 = vst [vmem:[#allocation2 + $0x48] sm:$0xff] %v1308_v0 }
  0x4d   : > { %220 = vst [vmem:[#allocation2 + $0x80] sm:$0xff] %v1308_v0 }
  0x4e   : > { %221 = vst [vmem:[#allocation2 + $0x88] sm:$0xff] %v1308_v0 }
  0x4f   : > { %222 = vst [vmem:[#allocation2 + $0xe8] sm:$0xff] %v1308_v0 }
  0x50   : > { %223 = vst [vmem:[#allocation2 + $0xb8] sm:$0xff] %v1308_v0 }
  0x51   : > { %224 = vst [vmem:[#allocation2 + $0x60] sm:$0xff] %v1308_v0 }
  0x52   : > { %225 = vst [vmem:[#allocation2 + $0xf0] sm:$0xff] %v1308_v0 }
  0x53   : > { %226 = vst [vmem:[#allocation2 + $0x8] sm:$0xff] %v1308_v0 }
  0x54   : > { %227 = vst [vmem:[#allocation2 + $0x78] sm:$0xff] %v1308_v0 }
  0x55   : > { %228 = vst [vmem:[#allocation2 + $0x38] sm:$0xff] %v1308_v0 }
  0x56   : > { %229 = vst [vmem:[#allocation2 + $0x58] sm:$0xff] %v1308_v0 }
  0x57   : > { %230 = vst [vmem:[#allocation2 + $0x40] sm:$0xff] %v1308_v0 }
  0x58   : > { %231 = vst [vmem:[#allocation2 + $0xc8] sm:$0xff] %v1308_v0 }
  0x59   : > { %232 = vst [vmem:[#allocation2 + $0xe0] sm:$0xff] %v1308_v0 }
  0x5a   : > { %233 = vst [vmem:[#allocation2 + $0x90] sm:$0xff] %v1308_v0 }
  0x5b   : > { %234 = vst [vmem:[#allocation2 + $0x70] sm:$0xff] %v1308_v0 }
  0x5c   : > { %235 = vst [vmem:[#allocation2 + $0xc0] sm:$0xff] %v1308_v0 }
  0x5d   : > { %236 = vst [vmem:[#allocation2 + $0xa8] sm:$0xff] %v1308_v0 }
  0x5e   : > { %237 = vst [vmem:[#allocation2 + $0xd0] sm:$0xff] %v1308_v0 }
  0x5f   : > { %238 = vst [vmem:[#allocation2 + $0x10] sm:$0xff] %v1308_v0 }
  0x60   : > { %239 = vst [vmem:[#allocation2 + $0x28] sm:$0xff] %v1308_v0 }
  0x61   : > { %240 = vst [vmem:[#allocation2 + $0xa0] sm:$0xff] %v1308_v0 }
  0x62   : > { %241 = vst [vmem:[#allocation2 + $0xf8] sm:$0xff] %v1308_v0 }
  0x63   : > { %242 = vst [vmem:[#allocation2 + $0x20] sm:$0xff] %v1308_v0 }
  0x64   : > { %243 = vst [vmem:[#allocation2 + $0x98] sm:$0xff] %v1308_v0 }
  0x65 PF: > { %s1633_s28 = sld [smem:[#allocation16_spill]] }
  0x6b   : > { %s244_s29 = smul.u32 9, %s1633_s28 }
  0x6d   : > { %s245_s4 = sadd.s32 %s1286_s21, %s244_s29 }
  0x6e   : > { %s246_s5 = sld [smem:[#allocation4 + %s245_s4]] }
  0x74   : > { %p828_p1 = scmp.le.s32.totalorder %s246_s5, 0 }
  0x75   : > { %s949_s14 = sshll.u32 (!%p828_p1), %s1286_s21, 6 }
  0x76   : > { %250 = sbr.rel (%p828_p1) target bundleno = 348 (0x15c), region = 44  ;;  %s1490_s26 = scalar_lea.vmem (!%p828_p1), [#allocation8], %s949_s14 }
  0x7b   : > { %v957_v1 = vld [vmem:[%s1490_s26 + $0x38] sm:$0xff]  ;;  %v956_v2 = vld [vmem:[%s1490_s26 + $0x30] sm:$0xff]  ;;  %v955_v3 = vld [vmem:[%s1490_s26 + $0x28] sm:$0xff] }
  0x7c   : > { %478 = vmatpush.bf16.msra.mxu0 %v957_v1  ;;  %959 = vmatpush.bf16.msra.mxu1 %v957_v1  ;;  %v954_v4 = vld [vmem:[%s1490_s26 + $0x20] sm:$0xff]  ;;  %v953_v5 = vld [vmem:[%s1490_s26 + $0x18] sm:$0xff]  ;;  %v952_v6 = vld [vmem:[%s1490_s26 + $0x10] sm:$0xff] }
  0x7d   : > { %960 = vmatpush.bf16.msra.mxu2 %v957_v1  ;;  %961 = vmatpush.bf16.msra.mxu3 %v957_v1  ;;  %v951_v7 = vld [vmem:[%s1490_s26 + $0x8] sm:$0xff]  ;;  %v950_v8 = vld [vmem:[%s1490_s26] sm:$0xff]  ;;  %v935_v17 = vld [vmem:[%s1471_s19 + $0x10] sm:$0xff] }
  0x7e   : > { %v933_v9 = vld [vmem:[%s1471_s19] sm:$0xff]  ;;  %v934_v13 = vld [vmem:[%s1471_s19 + $0x8] sm:$0xff]  ;;  %v939_v18 = vld [vmem:[%s1471_s19 + $0x30] sm:$0xff] }
  0x7f   : > { %v937_v10 = vld [vmem:[%s1471_s19 + $0x20] sm:$0xff]  ;;  %v938_v14 = vld [vmem:[%s1471_s19 + $0x28] sm:$0xff]  ;;  %v943_v19 = vld [vmem:[%s1471_s19 + $0x50] sm:$0xff] }
  0x80   : > { %479 = vmatpush.bf16.msra.mxu0 %v956_v2  ;;  %962 = vmatpush.bf16.msra.mxu1 %v956_v2  ;;  %v941_v11 = vld [vmem:[%s1471_s19 + $0x40] sm:$0xff]  ;;  %v942_v15 = vld [vmem:[%s1471_s19 + $0x48] sm:$0xff]  ;;  %v947_v20 = vld [vmem:[%s1471_s19 + $0x70] sm:$0xff] }
  0x81   : > { %963 = vmatpush.bf16.msra.mxu2 %v956_v2  ;;  %964 = vmatpush.bf16.msra.mxu3 %v956_v2  ;;  %v945_v12 = vld [vmem:[%s1471_s19 + $0x60] sm:$0xff]  ;;  %v946_v16 = vld [vmem:[%s1471_s19 + $0x68] sm:$0xff]  ;;  %v936_v21 = vld [vmem:[%s1471_s19 + $0x18] sm:$0xff] }
  0x82   : > { %v940_v22 = vld [vmem:[%s1471_s19 + $0x38] sm:$0xff]  ;;  %v251_v25 = vld [vmem:[#allocation2 + $0xb0] sm:$0xff]  ;;  %v259_v26 = vld [vmem:[#allocation2 + $0x80] sm:$0xff] }
  0x83   : > { %v944_v23 = vld [vmem:[%s1471_s19 + $0x58] sm:$0xff]  ;;  %v275_v32 = vld [vmem:[#allocation2 + $0xa8] sm:$0xff]  ;;  %v252_v33 = vld [vmem:[#allocation2] sm:$0xff] }
  0x84   : > { %480 = vmatpush.bf16.msra.mxu0 %v955_v3  ;;  %965 = vmatpush.bf16.msra.mxu1 %v955_v3  ;;  %v948_v24 = vld [vmem:[%s1471_s19 + $0x78] sm:$0xff]  ;;  %v260_v34 = vld [vmem:[#allocation2 + $0x88] sm:$0xff]  ;;  %v276_v44 = vld [vmem:[#allocation2 + $0xd0] sm:$0xff] }
  0x85   : > { %966 = vmatpush.bf16.msra.mxu2 %v955_v3  ;;  %967 = vmatpush.bf16.msra.mxu3 %v955_v3  ;;  %v267_v31 = vld [vmem:[#allocation2 + $0x38] sm:$0xff]  ;;  %v261_v46 = vld [vmem:[#allocation2 + $0xe8] sm:$0xff]  ;;  %v269_v55 = vld [vmem:[#allocation2 + $0x40] sm:$0xff] }
  0x86   : > { %v268_v43 = vld [vmem:[#allocation2 + $0x58] sm:$0xff]  ;;  %v277_v56 = vld [vmem:[#allocation2 + $0x10] sm:$0xff]  ;;  %v270_v3 = vld [vmem:[#allocation2 + $0xc8] sm:$0xff] }
  0x87   : > { %v253_v45 = vld [vmem:[#allocation2 + $0xd8] sm:$0xff] }
  0x88   : > { %481 = vmatpush.bf16.msra.mxu0 %v954_v4  ;;  %968 = vmatpush.bf16.msra.mxu1 %v954_v4  ;;  %v254_v57 = vld [vmem:[#allocation2 + $0x18] sm:$0xff] }
  0x89   : > { %969 = vmatpush.bf16.msra.mxu2 %v954_v4  ;;  %970 = vmatpush.bf16.msra.mxu3 %v954_v4  ;;  %v262_v58 = vld [vmem:[#allocation2 + $0xb8] sm:$0xff]  ;;  %v278_v4 = vld [vmem:[#allocation2 + $0x28] sm:$0xff] }
  0x8c   : > { %482 = vmatpush.bf16.msra.mxu0 %v953_v5  ;;  %971 = vmatpush.bf16.msra.mxu1 %v953_v5 }
  0x8d   : > { %972 = vmatpush.bf16.msra.mxu2 %v953_v5  ;;  %973 = vmatpush.bf16.msra.mxu3 %v953_v5  ;;  %v255_v5 = vld [vmem:[#allocation2 + $0x50] sm:$0xff] }
  0x90   : > { %483 = vmatpush.bf16.msra.mxu0 %v952_v6  ;;  %974 = vmatpush.bf16.msra.mxu1 %v952_v6 }
  0x91   : > { %975 = vmatpush.bf16.msra.mxu2 %v952_v6  ;;  %976 = vmatpush.bf16.msra.mxu3 %v952_v6  ;;  %v263_v6 = vld [vmem:[#allocation2 + $0x60] sm:$0xff] }
  0x94   : > { %484 = vmatpush.bf16.msra.mxu0 %v951_v7  ;;  %977 = vmatpush.bf16.msra.mxu1 %v951_v7 }
  0x95   : > { %978 = vmatpush.bf16.msra.mxu2 %v951_v7  ;;  %979 = vmatpush.bf16.msra.mxu3 %v951_v7 }
  0x98   : > { %485 = vmatpush.bf16.msra.mxu0 %v950_v8  ;;  %980 = vmatpush.bf16.msra.mxu1 %v950_v8 }
  0x99   : > { %981 = vmatpush.bf16.msra.mxu2 %v950_v8  ;;  %982 = vmatpush.bf16.msra.mxu3 %v950_v8 }
  0x9b   : > { %486 = vmatmul.bf16.vlgmr.msra.gmra.mxu0 %v933_v9  ;;  %506 = vmatmul.bf16.vlgmr.msra.gmra.mxu1 %v937_v10 }
  0x9c   : > { %526 = vmatmul.bf16.vlgmr.msra.gmra.mxu2 %v941_v11  ;;  %546 = vmatmul.bf16.vlgmr.msra.gmra.mxu3 %v945_v12 }
  0xab   : > { %491 = vmatmul.bf16.gmra.mxu0 %v934_v13  ;;  %511 = vmatmul.bf16.gmra.mxu1 %v938_v14 }
  0xac   : > { %531 = vmatmul.bf16.gmra.mxu2 %v942_v15  ;;  %551 = vmatmul.bf16.gmra.mxu3 %v946_v16  ;;  %v271_v15 = vld [vmem:[#allocation2 + $0xe0] sm:$0xff] }
  0xad   : > { %v279_v16 = vld [vmem:[#allocation2 + $0xa0] sm:$0xff] }
  0xbb   : > { %496 = vmatmul.bf16.gmra.mxu0 %v935_v17  ;;  %516 = vmatmul.bf16.gmra.mxu1 %v939_v18  ;;  %v256_v17 = vld [vmem:[#allocation2 + $0x68] sm:$0xff]  ;;  %v264_v18 = vld [vmem:[#allocation2 + $0xf0] sm:$0xff] }
  0xbc   : > { %536 = vmatmul.bf16.gmra.mxu2 %v943_v19  ;;  %556 = vmatmul.bf16.gmra.mxu3 %v947_v20 }
  0xcb   : > { %501 = vmatmul.bf16.gmra.mxu0 %v936_v21  ;;  %521 = vmatmul.bf16.gmra.mxu1 %v940_v22 }
  0xcc   : > { %541 = vmatmul.bf16.gmra.mxu2 %v944_v23  ;;  %561 = vmatmul.bf16.gmra.mxu3 %v948_v24 }
 0x118   : > { %v487_v27 = vpop.f32.mrf.mxu0  ;;  %v507_v28 = vpop.f32.mrf.mxu1 }
 0x119   : > { %v567_v29 = vadd.f32 %v487_v27, %v251_v25  ;;  %v575_v30 = vadd.f32 %v507_v28, %v259_v26  ;;  %v272_v27 = vld [vmem:[#allocation2 + $0x90] sm:$0xff]  ;;  %v280_v28 = vld [vmem:[#allocation2 + $0xf8] sm:$0xff] }
 0x11b   : > { %599 = vst [vmem:[#allocation2 + $0xb0] sm:$0xff] %v567_v29  ;;  %v257_v29 = vld [vmem:[#allocation2 + $0x30] sm:$0xff] }
 0x11c   : > { %607 = vst [vmem:[#allocation2 + $0x80] sm:$0xff] %v575_v30  ;;  %v265_v30 = vld [vmem:[#allocation2 + $0x8] sm:$0xff] }
 0x11f   : > { %v527_v35 = vpop.f32.mrf.mxu2  ;;  %v547_v36 = vpop.f32.mrf.mxu3 }
 0x120   : > { %v583_v37 = vadd.f32 %v527_v35, %v267_v31  ;;  %v591_v38 = vadd.f32 %v547_v36, %v275_v32  ;;  %v489_v39 = vpop.f32.mrf.mxu0  ;;  %v509_v40 = vpop.f32.mrf.mxu1 }
 0x121   : > { %v568_v41 = vadd.f32 %v489_v39, %v252_v33  ;;  %v576_v42 = vadd.f32 %v509_v40, %v260_v34  ;;  %v273_v39 = vld [vmem:[#allocation2 + $0x70] sm:$0xff]  ;;  %v281_v40 = vld [vmem:[#allocation2 + $0x20] sm:$0xff] }
 0x122   : > { %615 = vst [vmem:[#allocation2 + $0x38] sm:$0xff] %v583_v37 }
 0x123   : > { %623 = vst [vmem:[#allocation2 + $0xa8] sm:$0xff] %v591_v38 }
 0x124   : > { %600 = vst [vmem:[#allocation2] sm:$0xff] %v568_v41  ;;  %v258_v41 = vld [vmem:[#allocation2 + $0x48] sm:$0xff] }
 0x125   : > { %608 = vst [vmem:[#allocation2 + $0x88] sm:$0xff] %v576_v42  ;;  %v266_v42 = vld [vmem:[#allocation2 + $0x78] sm:$0xff] }
 0x127   : > { %v529_v47 = vpop.f32.mrf.mxu2  ;;  %v549_v48 = vpop.f32.mrf.mxu3 }
 0x128   : > { %v584_v49 = vadd.f32 %v529_v47, %v268_v43  ;;  %v592_v50 = vadd.f32 %v549_v48, %v276_v44  ;;  %v492_v51 = vpop.f32.mrf.mxu0  ;;  %v512_v52 = vpop.f32.mrf.mxu1 }
 0x129   : > { %v569_v53 = vadd.f32 %v492_v51, %v253_v45  ;;  %v577_v54 = vadd.f32 %v512_v52, %v261_v46  ;;  %v274_v51 = vld [vmem:[#allocation2 + $0xc0] sm:$0xff]  ;;  %v282_v52 = vld [vmem:[#allocation2 + $0x98] sm:$0xff] }
 0x12a   : > { %616 = vst [vmem:[#allocation2 + $0x58] sm:$0xff] %v584_v49 }
 0x12b   : > { %624 = vst [vmem:[#allocation2 + $0xd0] sm:$0xff] %v592_v50 }
 0x12c   : > { %601 = vst [vmem:[#allocation2 + $0xd8] sm:$0xff] %v569_v53 }
 0x12d   : > { %609 = vst [vmem:[#allocation2 + $0xe8] sm:$0xff] %v577_v54 }
 0x12f   : > { %v532_v59 = vpop.f32.mrf.mxu2  ;;  %v552_v60 = vpop.f32.mrf.mxu3 }
 0x130   : > { %v585_v61 = vadd.f32 %v532_v59, %v269_v55  ;;  %v593_v62 = vadd.f32 %v552_v60, %v277_v56  ;;  %v494_v63 = vpop.f32.mrf.mxu0  ;;  %v514_v0 = vpop.f32.mrf.mxu1 }
 0x131   : > { %v570_v1 = vadd.f32 %v494_v63, %v254_v57  ;;  %v578_v2 = vadd.f32 %v514_v0, %v262_v58 }
 0x132   : > { %617 = vst [vmem:[#allocation2 + $0x40] sm:$0xff] %v585_v61 }
 0x133   : > { %625 = vst [vmem:[#allocation2 + $0x10] sm:$0xff] %v593_v62 }
 0x134   : > { %602 = vst [vmem:[#allocation2 + $0x18] sm:$0xff] %v570_v1 }
 0x135   : > { %610 = vst [vmem:[#allocation2 + $0xb8] sm:$0xff] %v578_v2 }
 0x137   : > { %v534_v7 = vpop.f32.mrf.mxu2  ;;  %v554_v8 = vpop.f32.mrf.mxu3 }
 0x138   : > { %v586_v9 = vadd.f32 %v534_v7, %v270_v3  ;;  %v594_v10 = vadd.f32 %v554_v8, %v278_v4  ;;  %v497_v11 = vpop.f32.mrf.mxu0  ;;  %v517_v12 = vpop.f32.mrf.mxu1 }
 0x139   : > { %v571_v13 = vadd.f32 %v497_v11, %v255_v5  ;;  %v579_v14 = vadd.f32 %v517_v12, %v263_v6 }
 0x13a   : > { %618 = vst [vmem:[#allocation2 + $0xc8] sm:$0xff] %v586_v9 }
 0x13b   : > { %626 = vst [vmem:[#allocation2 + $0x28] sm:$0xff] %v594_v10 }
 0x13c   : > { %603 = vst [vmem:[#allocation2 + $0x50] sm:$0xff] %v571_v13 }
 0x13d   : > { %611 = vst [vmem:[#allocation2 + $0x60] sm:$0xff] %v579_v14 }
 0x13f   : > { %v537_v19 = vpop.f32.mrf.mxu2  ;;  %v557_v20 = vpop.f32.mrf.mxu3 }
 0x140   : > { %v587_v21 = vadd.f32 %v537_v19, %v271_v15  ;;  %v595_v22 = vadd.f32 %v557_v20, %v279_v16  ;;  %v499_v23 = vpop.f32.mrf.mxu0  ;;  %v519_v24 = vpop.f32.mrf.mxu1 }
 0x141   : > { %v572_v25 = vadd.f32 %v499_v23, %v256_v17  ;;  %v580_v26 = vadd.f32 %v519_v24, %v264_v18 }
 0x142   : > { %619 = vst [vmem:[#allocation2 + $0xe0] sm:$0xff] %v587_v21 }
 0x143   : > { %627 = vst [vmem:[#allocation2 + $0xa0] sm:$0xff] %v595_v22 }
 0x144   : > { %604 = vst [vmem:[#allocation2 + $0x68] sm:$0xff] %v572_v25 }
 0x145   : > { %612 = vst [vmem:[#allocation2 + $0xf0] sm:$0xff] %v580_v26 }
 0x147   : > { %v539_v31 = vpop.f32.mrf.mxu2  ;;  %v559_v32 = vpop.f32.mrf.mxu3 }
 0x148   : > { %v588_v33 = vadd.f32 %v539_v31, %v272_v27  ;;  %v596_v34 = vadd.f32 %v559_v32, %v280_v28  ;;  %v502_v35 = vpop.f32.mrf.mxu0  ;;  %v522_v36 = vpop.f32.mrf.mxu1 }
 0x149   : > { %v573_v37 = vadd.f32 %v502_v35, %v257_v29  ;;  %v581_v38 = vadd.f32 %v522_v36, %v265_v30 }
 0x14a   : > { %620 = vst [vmem:[#allocation2 + $0x90] sm:$0xff] %v588_v33 }
 0x14b   : > { %628 = vst [vmem:[#allocation2 + $0xf8] sm:$0xff] %v596_v34 }
 0x14c   : > { %605 = vst [vmem:[#allocation2 + $0x30] sm:$0xff] %v573_v37 }
 0x14d   : > { %613 = vst [vmem:[#allocation2 + $0x8] sm:$0xff] %v581_v38 }
 0x14f   : > { %v542_v43 = vpop.f32.mrf.mxu2  ;;  %v562_v44 = vpop.f32.mrf.mxu3 }
 0x150   : > { %v589_v45 = vadd.f32 %v542_v43, %v273_v39  ;;  %v597_v46 = vadd.f32 %v562_v44, %v281_v40  ;;  %v504_v47 = vpop.f32.mrf.mxu0  ;;  %v524_v48 = vpop.f32.mrf.mxu1 }
 0x151   : > { %v574_v49 = vadd.f32 %v504_v47, %v258_v41  ;;  %v582_v50 = vadd.f32 %v524_v48, %v266_v42 }
 0x152   : > { %621 = vst [vmem:[#allocation2 + $0x70] sm:$0xff] %v589_v45 }
 0x153   : > { %629 = vst [vmem:[#allocation2 + $0x20] sm:$0xff] %v597_v46 }
 0x154   : > { %606 = vst [vmem:[#allocation2 + $0x48] sm:$0xff] %v574_v49 }
 0x155   : > { %614 = vst [vmem:[#allocation2 + $0x78] sm:$0xff] %v582_v50 }
 0x157   : > { %v544_v53 = vpop.f32.mrf.mxu2  ;;  %v564_v54 = vpop.f32.mrf.mxu3 }
 0x158   : > { %v590_v55 = vadd.f32 %v544_v53, %v274_v51  ;;  %v598_v56 = vadd.f32 %v564_v54, %v282_v52 }
 0x15a   : > { %622 = vst [vmem:[#allocation2 + $0xc0] sm:$0xff] %v590_v55 }
 0x15b   : > { %630 = vst [vmem:[#allocation2 + $0x98] sm:$0xff] %v598_v56 }
 0x15c PF: > { %p927_p4 = scmp.ne.s32.totalorder %s1286_s21, 8 }
 0x15e   : > { %634 = sbr.rel (%p927_p4) target bundleno = 388 (0x184), region = 48 }
 0x163   : > { %v635_v57 = vld [vmem:[#allocation2 + $0xb0] sm:$0xff]  ;;  %v636_v58 = vld [vmem:[#allocation2] sm:$0xff]  ;;  %v637_v59 = vld [vmem:[#allocation2 + $0xd8] sm:$0xff] }
 0x164   : > { %667 = vst [vmem:[%s1484_s30] sm:$0xff] %v635_v57  ;;  %v638_v60 = vld [vmem:[#allocation2 + $0x18] sm:$0xff]  ;;  %v639_v61 = vld [vmem:[#allocation2 + $0x50] sm:$0xff]  ;;  %v640_v62 = vld [vmem:[#allocation2 + $0x68] sm:$0xff] }
 0x165   : > { %668 = vst [vmem:[%s1484_s30 + $0x8] sm:$0xff] %v636_v58  ;;  %v641_v63 = vld [vmem:[#allocation2 + $0x30] sm:$0xff]  ;;  %v642_v0 = vld [vmem:[#allocation2 + $0x48] sm:$0xff]  ;;  %v643_v1 = vld [vmem:[#allocation2 + $0x80] sm:$0xff] }
 0x166   : > { %669 = vst [vmem:[%s1484_s30 + $0x10] sm:$0xff] %v637_v59  ;;  %v644_v2 = vld [vmem:[#allocation2 + $0x88] sm:$0xff]  ;;  %v646_v4 = vld [vmem:[#allocation2 + $0xb8] sm:$0xff]  ;;  %v647_v5 = vld [vmem:[#allocation2 + $0x60] sm:$0xff] }
 0x167   : > { %670 = vst [vmem:[%s1484_s30 + $0x18] sm:$0xff] %v638_v60  ;;  %v645_v3 = vld [vmem:[#allocation2 + $0xe8] sm:$0xff]  ;;  %v648_v6 = vld [vmem:[#allocation2 + $0xf0] sm:$0xff]  ;;  %v650_v8 = vld [vmem:[#allocation2 + $0x78] sm:$0xff] }
 0x168   : > { %671 = vst [vmem:[%s1484_s30 + $0x20] sm:$0xff] %v639_v61  ;;  %v649_v7 = vld [vmem:[#allocation2 + $0x8] sm:$0xff]  ;;  %v651_v9 = vld [vmem:[#allocation2 + $0x38] sm:$0xff]  ;;  %v653_v11 = vld [vmem:[#allocation2 + $0x40] sm:$0xff] }
 0x169   : > { %672 = vst [vmem:[%s1484_s30 + $0x28] sm:$0xff] %v640_v62  ;;  %v652_v10 = vld [vmem:[#allocation2 + $0x58] sm:$0xff]  ;;  %v654_v12 = vld [vmem:[#allocation2 + $0xc8] sm:$0xff]  ;;  %v655_v13 = vld [vmem:[#allocation2 + $0xe0] sm:$0xff] }
 0x16a   : > { %673 = vst [vmem:[%s1484_s30 + $0x30] sm:$0xff] %v641_v63  ;;  %v656_v14 = vld [vmem:[#allocation2 + $0x90] sm:$0xff]  ;;  %v658_v16 = vld [vmem:[#allocation2 + $0xc0] sm:$0xff]  ;;  %v659_v17 = vld [vmem:[#allocation2 + $0xa8] sm:$0xff] }
 0x16b   : > { %674 = vst [vmem:[%s1484_s30 + $0x38] sm:$0xff] %v642_v0  ;;  %v657_v15 = vld [vmem:[#allocation2 + $0x70] sm:$0xff]  ;;  %v662_v20 = vld [vmem:[#allocation2 + $0x28] sm:$0xff]  ;;  %v663_v21 = vld [vmem:[#allocation2 + $0xa0] sm:$0xff] }
 0x16c   : > { %675 = vst [vmem:[%s1484_s30 + $0x40] sm:$0xff] %v643_v1  ;;  %v660_v18 = vld [vmem:[#allocation2 + $0xd0] sm:$0xff]  ;;  %v664_v22 = vld [vmem:[#allocation2 + $0xf8] sm:$0xff]  ;;  %v665_v23 = vld [vmem:[#allocation2 + $0x20] sm:$0xff] }
 0x16d   : > { %676 = vst [vmem:[%s1484_s30 + $0x48] sm:$0xff] %v644_v2  ;;  %v661_v19 = vld [vmem:[#allocation2 + $0x10] sm:$0xff]  ;;  %v666_v24 = vld [vmem:[#allocation2 + $0x98] sm:$0xff] }
 0x16e   : > { %677 = vst [vmem:[%s1484_s30 + $0x50] sm:$0xff] %v645_v3 }
 0x16f   : > { %678 = vst [vmem:[%s1484_s30 + $0x58] sm:$0xff] %v646_v4 }
 0x170   : > { %679 = vst [vmem:[%s1484_s30 + $0x60] sm:$0xff] %v647_v5 }
 0x171   : > { %680 = vst [vmem:[%s1484_s30 + $0x68] sm:$0xff] %v648_v6 }
 0x172   : > { %681 = vst [vmem:[%s1484_s30 + $0x70] sm:$0xff] %v649_v7 }
 0x173   : > { %682 = vst [vmem:[%s1484_s30 + $0x78] sm:$0xff] %v650_v8 }
 0x174   : > { %683 = vst [vmem:[%s1484_s30 + $0x80] sm:$0xff] %v651_v9 }
 0x175   : > { %684 = vst [vmem:[%s1484_s30 + $0x88] sm:$0xff] %v652_v10 }
 0x176   : > { %685 = vst [vmem:[%s1484_s30 + $0x90] sm:$0xff] %v653_v11 }
 0x177   : > { %686 = vst [vmem:[%s1484_s30 + $0x98] sm:$0xff] %v654_v12 }
 0x178   : > { %687 = vst [vmem:[%s1484_s30 + $0xa0] sm:$0xff] %v655_v13 }
 0x179   : > { %688 = vst [vmem:[%s1484_s30 + $0xa8] sm:$0xff] %v656_v14 }
 0x17a   : > { %689 = vst [vmem:[%s1484_s30 + $0xb0] sm:$0xff] %v657_v15 }
 0x17b   : > { %690 = vst [vmem:[%s1484_s30 + $0xb8] sm:$0xff] %v658_v16 }
 0x17c   : > { %691 = vst [vmem:[%s1484_s30 + $0xc0] sm:$0xff] %v659_v17 }
 0x17d   : > { %692 = vst [vmem:[%s1484_s30 + $0xc8] sm:$0xff] %v660_v18 }
 0x17e   : > { %693 = vst [vmem:[%s1484_s30 + $0xd0] sm:$0xff] %v661_v19 }
 0x17f   : > { %694 = vst [vmem:[%s1484_s30 + $0xd8] sm:$0xff] %v662_v20 }
 0x180   : > { %695 = vst [vmem:[%s1484_s30 + $0xe0] sm:$0xff] %v663_v21 }
 0x181   : > { %696 = vst [vmem:[%s1484_s30 + $0xe8] sm:$0xff] %v664_v22 }
 0x182   : > { %697 = vst [vmem:[%s1484_s30 + $0xf0] sm:$0xff] %v665_v23 }
 0x183   : > { %698 = vst [vmem:[%s1484_s30 + $0xf8] sm:$0xff] %v666_v24 }
 0x184 PF: > { %s1634_s21 = sld [smem:[#allocation16_spill]]  ;;  %s712_s9 = sshll.u32 %s1484_s30, 4  ;;  %s713_s9 = int_to_ptr.vmem [resolvable:$true] %s712_s9 }
 0x185   : > { %s1636_s8 = sld [smem:[#allocation22_spill]]  ;;  %s700_s16 = scalar_lea.sflag [#allocation7], %s203_s3 }
 0x18a   : > { %s958_s7 = sshll.u32 %s1634_s21, 8 }
 0x18b   : > { %s711_s27 = scalar_lea.hbm %s1636_s8, %s958_s7  ;;  %s1194_s29 = scalar_lea.hbm %s1636_s8, 512 }
 0x18c   : > { %s714_s2 = sshll.u32 %s711_s27, 4  ;;  %s715_s2 = int_to_ptr.hbm [resolvable:$true] %s714_s2 }
 0x18d   : > { %s1188_s13 = sshra.s32 %s715_s2, 4  ;;  %s1189_s13 = int_to_ptr.hbm [resolvable:$true] %s1188_s13 }
 0x18e   : > { %s1190_s19 = scalar_lea.hbm %s1189_s13, 256  ;;  %p1195_p5 = scmp.lt.s32.totalorder %s1189_s13, %s1636_s8 }
 0x18f   : > { %p1191_p0 = scmp.ne.s32.totalorder %s1189_s13, %s1190_s19  ;;  %p1196_p7 = scmp.lt.s32.totalorder %s1194_s29, %s1190_s19 }
 0x191   : > { %p1192_p2 = pnand %p1191_p0, %p1404_p6  ;;  %p1197_p8 = por %p1196_p7, %p1195_p5 }
 0x193   : > { %p1193_p3 = pneg %p1192_p2 }
 0x195   : > { %p1198_p9 = pnand %p1197_p8, %p1193_p3 }
 0x197   : > { %1201 = shalt.err (!%p1198_p9)
}
 0x198   : > { %s1309_s3 = smov 128   ;;  %s1310_s30 = smov 8  }
 0x199   : > { %989 = dma.vmem_to_hbm [thread:$0]  (%p1404_p6), %s713_s9, 4096, %s715_s2, %s700_s16, %s1309_s3, %s1309_s3, %s1310_s30  }
 0x19a PF: > { %s1637_s14 = sld [smem:[#allocation15_spill]]  ;;  %p1006_p12 = scmp.ge.s32.totalorder %s1302_s25, 2 }
 0x19c   : > { %p1000_p13 = pnand %p1006_p12, %p1410_p10 }
 0x19e   : > { %p1001_p11 = pneg %p1000_p13 }
 0x1a0   : > { %s729_s21 = sand.u32 1, %s1637_s14  }
 0x1a1   : > { %s730_s7 = scalar_lea.sflag [#allocation7], %s729_s21 }
 0x1a2   : > { %1257 = dma.done.wait (%p1001_p11), %s730_s7, 4096  }
 0x1a3   : > { %1259 = vsyncadd (%p1001_p11), %s730_s7, 4294963200  ;;  %s28_s25 = sadd.s32 1, %s1302_s25   ;;  %s1639_s6 = sld [smem:[#allocation19_spill]] }
 0x1a4   : > { %p25_p1 = scmp.ge.s32.totalorder %s28_s25, 20   ;;  %s1640_s10 = sld [smem:[#allocation20_spill]] }
 0x1a5   : > { %s1641_s16 = smov %s1266_s17  ;;  %s1642_s17 = smov %s1270_s18 }
 0x1a6   : > { %s1643_s18 = smov %s1452_s11  ;;  %s1644_s19 = smov %s1278_s0 }
 0x1a7   : > { %s1645_s0 = smov %s1282_s20  ;;  %s1646_s20 = smov %s1455_s12 }
 0x1a8   : > { %s1647_s21 = smov %s1294_s23  ;;  %s1648_s22 = smov %s1298_s24 }
 0x1a9   : > { %s1649_s23 = smov %s1639_s6  ;;  %27 = sbr.rel (!%p25_p1) target bundleno = 17 (0x11), region = 90 }
 0x1aa   : > { %s1650_s24 = smov %s1640_s10 }
 0x1ae   :  { %736 = vsyncpa [#allocation6], 1 }
 0x1af   :  { %738 = vsyncpa [#allocation6 + $0x1], 1 }
 0x1b0   :  { %739 = vsyncpa [#allocation9], 1 }
 0x1b1   :  { %740 = vsyncpa [#allocation7], 1 }
 0x1b2   :  { %742 = vsyncpa [#allocation7 + $0x1], 1 }

</bundles_post_ra>
